<compile_context>
chip_gen: v7x
topology: tpu7x:2x2x1
jax: 0.10.0
libtpu: 0.0.40
codegen_flags: <defaults>
</compile_context>

<pallas_src>
import functools

import jax
import jax.numpy as jnp
from jax.experimental import pallas as pl
from jax.experimental.pallas import tpu as pltpu

OUT_PAD = 128  # lane-dense output width inside the kernel


def final_layer_kernel(x_ref, c_ref, tcat_ref, wsh_ref, wsc_ref, bsh_ref,
                       bsc_ref, wg_ref, bg_ref, o_ref, *, n, b, n_cheb):
    x = x_ref[...]                                        # [B*N, D]
    c = c_ref[...]                                        # [B*N, D]

    # --- adaLN modulation: SiLU -> two D->D projections (pre-split weights) ---
    h = c * jax.nn.sigmoid(c)                             # SiLU
    shift = jnp.dot(h, wsh_ref[...],
                    preferred_element_type=jnp.float32) + bsh_ref[...]
    scale = jnp.dot(h, wsc_ref[...],
                    preferred_element_type=jnp.float32) + bsc_ref[...]

    # --- LayerNorm (no affine, eps=1e-6) + modulate ---------------------------
    mu = jnp.mean(x, axis=-1, keepdims=True)
    xc = x - mu
    var = jnp.mean(xc * xc, axis=-1, keepdims=True)
    xm = xc * jax.lax.rsqrt(var + 1e-6) * (1.0 + scale) + shift   # [B*N, D]

    # --- ChebConv, projection first:  y_k = xm @ W_k (lane-padded to OUT_PAD) -
    ys = [jnp.dot(xm, wg_ref[k], preferred_element_type=jnp.float32)
          for k in range(n_cheb)]                         # each [B*N, OUT_PAD]

    # --- graph contraction, fused over k: acc_b = [T0|T1|T2] @ [y0_b;y1_b;y2_b]
    tcat = tcat_ref[...]                                  # [N, n_cheb*N]
    bias = bg_ref[...]                                    # [1, OUT_PAD]
    for bi in range(b):                                   # B is tiny & static
        ycat = jnp.concatenate(
            [y[bi * n:(bi + 1) * n, :] for y in ys], axis=0)  # [n_cheb*N, OUT_PAD]
        acc = jnp.dot(tcat, ycat, preferred_element_type=jnp.float32) + bias
        o_ref[bi * n:(bi + 1) * n, :] = acc.astype(o_ref.dtype)


def final_layer(x, adj, c, w_mod, b_mod, w_g, b_g):
    b, n, dim = x.shape
    n_cheb, _, out_c = w_g.shape

    # ---- tiny one-off XLA-side preprocessing --------------------------------
    x2 = x.reshape(b * n, dim)
    c2 = c.reshape(b * n, dim)

    deg = adj.sum(-1)
    d_is = jnp.where(deg > 0, jax.lax.rsqrt(deg), 0.0)    # clamp zero-degree
    eye = jnp.eye(n, dtype=jnp.float32)
    lap = eye - d_is[:, None] * adj * d_is[None, :]
    t2 = 2.0 * (lap @ lap) - eye
    t_cat = jnp.concatenate([eye, lap, t2], axis=1)       # [N, n_cheb*N]

    w_shift = w_mod[:, :dim]                              # [D, D]
    w_scale = w_mod[:, dim:]                              # [D, D]
    b_shift = b_mod[:dim].reshape(1, dim)
    b_scale = b_mod[dim:].reshape(1, dim)

    w_g_pad = jnp.pad(w_g, ((0, 0), (0, 0), (0, OUT_PAD - out_c)))
    b_g_pad = jnp.pad(b_g, (0, OUT_PAD - out_c)).reshape(1, OUT_PAD)

    kernel = functools.partial(final_layer_kernel, n=n, b=b, n_cheb=n_cheb)

    grid_spec = pltpu.PrefetchScalarGridSpec(
        num_scalar_prefetch=0,
        grid=(1,),                                        # single step: no bubble
        in_specs=[
            pl.BlockSpec((b * n, dim), lambda i: (0, 0)),          # x
            pl.BlockSpec((b * n, dim), lambda i: (0, 0)),          # c
            pl.BlockSpec((n, n_cheb * n), lambda i: (0, 0)),       # [T0|T1|T2]
            pl.BlockSpec((dim, dim), lambda i: (0, 0)),            # w_shift
            pl.BlockSpec((dim, dim), lambda i: (0, 0)),            # w_scale
            pl.BlockSpec((1, dim), lambda i: (0, 0)),              # b_shift
            pl.BlockSpec((1, dim), lambda i: (0, 0)),              # b_scale
            pl.BlockSpec((n_cheb, dim, OUT_PAD), lambda i: (0, 0, 0)),  # W_g pad
            pl.BlockSpec((1, OUT_PAD), lambda i: (0, 0)),          # b_g pad
        ],
        out_specs=pl.BlockSpec((b * n, OUT_PAD), lambda i: (0, 0)),
    )

    out_pad = pl.pallas_call(
        kernel,
        out_shape=jax.ShapeDtypeStruct((b * n, OUT_PAD), jnp.float32),
        grid_spec=grid_spec,
        compiler_params=pltpu.CompilerParams(
            dimension_semantics=("arbitrary",)),
    )(x2, c2, t_cat, w_shift, w_scale, b_shift, b_scale, w_g_pad, b_g_pad)

    return out_pad[:, :out_c].reshape(b, n, out_c)


def final_layer_reference(x, adj, c, w_mod, b_mod, w_g, b_g):
    dim = x.shape[-1]
    h = c * jax.nn.sigmoid(c)
    mod = h @ w_mod + b_mod
    shift, scale = mod[..., :dim], mod[..., dim:]
    mu = x.mean(-1, keepdims=True)
    var = ((x - mu) ** 2).mean(-1, keepdims=True)
    xn = (x - mu) / jnp.sqrt(var + 1e-6)
    xm = xn * (1.0 + scale) + shift
    deg = adj.sum(-1)
    d = deg ** -0.5
    eye = jnp.eye(adj.shape[0], dtype=jnp.float32)
    lap = eye - d[:, None] * adj * d[None, :]
    cheb = jnp.stack([eye, lap, 2.0 * lap @ lap - eye])
    res = jnp.einsum('knm,bmd->kbnd', cheb, xm)
    res = jnp.einsum('kbnd,kdo->bno', res, w_g) + b_g
    return res


if __name__ == "__main__":
    B, N, DIM, OUT_C, K_CHEB = 2, 16, 32, 3, 3   # ChebConv(K=2) -> K+1 = 3 terms

    key = jax.random.PRNGKey(0)
    k1, k2, k3, k4, k5, k6, k7 = jax.random.split(key, 7)

    x = jax.random.normal(k1, (B, N, DIM), jnp.float32)
    c = jax.random.normal(k2, (B, N, DIM), jnp.float32)

    a = jax.random.uniform(k3, (N, N), jnp.float32)
    adj = (a + a.T) * 0.5 + jnp.eye(N, dtype=jnp.float32)   # symmetric, pos deg

    # adaLN_modulation: nn.Linear(dim, 2*dim)  (stored as [D, 2D] for x @ W)
    w_mod = 0.05 * jax.random.normal(k4, (DIM, 2 * DIM), jnp.float32)
    b_mod = 0.05 * jax.random.normal(k5, (2 * DIM,), jnp.float32)

    # ChebConv weights: [K+1, in_c, out_c], bias [out_c]
    w_g = (1.0 / jnp.sqrt(DIM)) * jax.random.normal(
        k6, (K_CHEB, DIM, OUT_C), jnp.float32)
    b_g = 0.05 * jax.random.normal(k7, (OUT_C,), jnp.float32)

    out = final_layer(x, adj, c, w_mod, b_mod, w_g, b_g)
    out = jax.block_until_ready(out)

    ref = final_layer_reference(x, adj, c, w_mod, b_mod, w_g, b_g)
    assert out.shape == (B, N, OUT_C)
    assert jnp.allclose(out, ref, rtol=1e-4, atol=1e-4), "mismatch vs reference"

    print("KERNEL_OK")
</pallas_src>

<mosaic_0001>
module attributes {stable_mosaic.version = 11 : i64} {
  func.func @final_layer_kernel(%arg0: i32, %arg1: memref<32x32xf32, #tpu.memory_space<vmem>>, %arg2: memref<32x32xf32, #tpu.memory_space<vmem>>, %arg3: memref<16x48xf32, #tpu.memory_space<vmem>>, %arg4: memref<32x32xf32, #tpu.memory_space<vmem>>, %arg5: memref<32x32xf32, #tpu.memory_space<vmem>>, %arg6: memref<1x32xf32, #tpu.memory_space<vmem>>, %arg7: memref<1x32xf32, #tpu.memory_space<vmem>>, %arg8: memref<3x32x128xf32, #tpu.memory_space<vmem>>, %arg9: memref<1x128xf32, #tpu.memory_space<vmem>>, %arg10: memref<32x128xf32, #tpu.memory_space<vmem>>) attributes {dimension_semantics = [#tpu.dimension_semantics<arbitrary>], iteration_bounds = array<i64: 1>, scalar_prefetch = 0 : i64, scratch_operands = 0 : i64, tpu.core_type = #tpu.core_type<tc>, window_params = [{pipeline_mode = #tpu.pipeline_mode<synchronous>, transform_indices = @transform_0, window_bounds = array<i64: 32, 32>}, {pipeline_mode = #tpu.pipeline_mode<synchronous>, transform_indices = @transform_1, window_bounds = array<i64: 32, 32>}, {pipeline_mode = #tpu.pipeline_mode<synchronous>, transform_indices = @transform_2, window_bounds = array<i64: 16, 48>}, {pipeline_mode = #tpu.pipeline_mode<synchronous>, transform_indices = @transform_3, window_bounds = array<i64: 32, 32>}, {pipeline_mode = #tpu.pipeline_mode<synchronous>, transform_indices = @transform_4, window_bounds = array<i64: 32, 32>}, {pipeline_mode = #tpu.pipeline_mode<synchronous>, transform_indices = @transform_5, window_bounds = array<i64: 1, 32>}, {pipeline_mode = #tpu.pipeline_mode<synchronous>, transform_indices = @transform_6, window_bounds = array<i64: 1, 32>}, {pipeline_mode = #tpu.pipeline_mode<synchronous>, transform_indices = @transform_7, window_bounds = array<i64: 3, 32, 128>}, {pipeline_mode = #tpu.pipeline_mode<synchronous>, transform_indices = @transform_8, window_bounds = array<i64: 1, 128>}, {pipeline_mode = #tpu.pipeline_mode<synchronous>, transform_indices = @transform_9, window_bounds = array<i64: 32, 128>}]} {
    %c0 = arith.constant 0 : index
    %c0_0 = arith.constant 0 : index
    %0 = vector.load %arg1[%c0, %c0_0] : memref<32x32xf32, #tpu.memory_space<vmem>>, vector<32x32xf32>
    %c0_1 = arith.constant 0 : index
    %c0_2 = arith.constant 0 : index
    %1 = vector.load %arg2[%c0_1, %c0_2] : memref<32x32xf32, #tpu.memory_space<vmem>>, vector<32x32xf32>
    %2 = arith.negf %1 : vector<32x32xf32>
    %3 = math.exp %2 : vector<32x32xf32>
    %cst = arith.constant 1.000000e+00 : f32
    %4 = vector.broadcast %cst : f32 to vector<32x32xf32>
    %5 = arith.addf %4, %3 : vector<32x32xf32>
    %6 = arith.divf %4, %5 : vector<32x32xf32>
    %7 = arith.mulf %1, %6 : vector<32x32xf32>
    %c0_3 = arith.constant 0 : index
    %c0_4 = arith.constant 0 : index
    %8 = vector.load %arg4[%c0_3, %c0_4] : memref<32x32xf32, #tpu.memory_space<vmem>>, vector<32x32xf32>
    %cst_5 = arith.constant dense<0.000000e+00> : vector<32x32xf32>
    %9 = tpu.matmul %7, %8, %cst_5 {dimension_numbers = #tpu.dot_dimension_numbers<[1], [0], [0], [1], [0, 0, 1, 1], [], []>} : vector<32x32xf32>, vector<32x32xf32>, vector<32x32xf32> -> vector<32x32xf32>
    %c0_6 = arith.constant 0 : index
    %c0_7 = arith.constant 0 : index
    %10 = vector.load %arg6[%c0_6, %c0_7] : memref<1x32xf32, #tpu.memory_space<vmem>>, vector<1x32xf32>
    %11 = vector.broadcast %10 : vector<1x32xf32> to vector<32x32xf32>
    %12 = arith.addf %9, %11 : vector<32x32xf32>
    %c0_8 = arith.constant 0 : index
    %c0_9 = arith.constant 0 : index
    %13 = vector.load %arg5[%c0_8, %c0_9] : memref<32x32xf32, #tpu.memory_space<vmem>>, vector<32x32xf32>
    %cst_10 = arith.constant dense<0.000000e+00> : vector<32x32xf32>
    %14 = tpu.matmul %7, %13, %cst_10 {dimension_numbers = #tpu.dot_dimension_numbers<[1], [0], [0], [1], [0, 0, 1, 1], [], []>} : vector<32x32xf32>, vector<32x32xf32>, vector<32x32xf32> -> vector<32x32xf32>
    %c0_11 = arith.constant 0 : index
    %c0_12 = arith.constant 0 : index
    %15 = vector.load %arg7[%c0_11, %c0_12] : memref<1x32xf32, #tpu.memory_space<vmem>>, vector<1x32xf32>
    %16 = vector.broadcast %15 : vector<1x32xf32> to vector<32x32xf32>
    %17 = arith.addf %14, %16 : vector<32x32xf32>
    %cst_13 = arith.constant dense<0.000000e+00> : vector<32xf32>
    %18 = vector.multi_reduction <add>, %0, %cst_13 [1] : vector<32x32xf32> to vector<32xf32>
    %19 = vector.shape_cast %18 : vector<32xf32> to vector<32x1xf32>
    %cst_14 = arith.constant 3.200000e+01 : f32
    %20 = vector.broadcast %cst_14 : f32 to vector<32x1xf32>
    %21 = arith.divf %19, %20 : vector<32x1xf32>
    %22 = vector.broadcast %21 : vector<32x1xf32> to vector<32x32xf32>
    %23 = arith.subf %0, %22 : vector<32x32xf32>
    %24 = arith.mulf %23, %23 : vector<32x32xf32>
    %cst_15 = arith.constant dense<0.000000e+00> : vector<32xf32>
    %25 = vector.multi_reduction <add>, %24, %cst_15 [1] : vector<32x32xf32> to vector<32xf32>
    %26 = vector.shape_cast %25 : vector<32xf32> to vector<32x1xf32>
    %cst_16 = arith.constant 3.200000e+01 : f32
    %27 = vector.broadcast %cst_16 : f32 to vector<32x1xf32>
    %28 = arith.divf %26, %27 : vector<32x1xf32>
    %cst_17 = arith.constant 9.99999997E-7 : f32
    %29 = vector.broadcast %cst_17 : f32 to vector<32x1xf32>
    %30 = arith.addf %28, %29 : vector<32x1xf32>
    %31 = math.rsqrt %30 : vector<32x1xf32>
    %32 = vector.broadcast %31 : vector<32x1xf32> to vector<32x32xf32>
    %33 = arith.mulf %23, %32 : vector<32x32xf32>
    %cst_18 = arith.constant 1.000000e+00 : f32
    %34 = vector.broadcast %cst_18 : f32 to vector<32x32xf32>
    %35 = arith.addf %34, %17 : vector<32x32xf32>
    %36 = arith.mulf %33, %35 : vector<32x32xf32>
    %37 = arith.addf %36, %12 : vector<32x32xf32>
    %c0_19 = arith.constant 0 : index
    %c0_20 = arith.constant 0 : index
    %c0_21 = arith.constant 0 : index
    %38 = vector.load %arg8[%c0_19, %c0_20, %c0_21] : memref<3x32x128xf32, #tpu.memory_space<vmem>>, vector<1x32x128xf32>
    %39 = vector.shape_cast %38 : vector<1x32x128xf32> to vector<32x128xf32>
    %cst_22 = arith.constant dense<0.000000e+00> : vector<32x128xf32>
    %40 = tpu.matmul %37, %39, %cst_22 {dimension_numbers = #tpu.dot_dimension_numbers<[1], [0], [0], [1], [0, 0, 1, 1], [], []>} : vector<32x32xf32>, vector<32x128xf32>, vector<32x128xf32> -> vector<32x128xf32>
    %c1 = arith.constant 1 : index
    %c0_23 = arith.constant 0 : index
    %c0_24 = arith.constant 0 : index
    %41 = vector.load %arg8[%c1, %c0_23, %c0_24] : memref<3x32x128xf32, #tpu.memory_space<vmem>>, vector<1x32x128xf32>
    %42 = vector.shape_cast %41 : vector<1x32x128xf32> to vector<32x128xf32>
    %cst_25 = arith.constant dense<0.000000e+00> : vector<32x128xf32>
    %43 = tpu.matmul %37, %42, %cst_25 {dimension_numbers = #tpu.dot_dimension_numbers<[1], [0], [0], [1], [0, 0, 1, 1], [], []>} : vector<32x32xf32>, vector<32x128xf32>, vector<32x128xf32> -> vector<32x128xf32>
    %c2 = arith.constant 2 : index
    %c0_26 = arith.constant 0 : index
    %c0_27 = arith.constant 0 : index
    %44 = vector.load %arg8[%c2, %c0_26, %c0_27] : memref<3x32x128xf32, #tpu.memory_space<vmem>>, vector<1x32x128xf32>
    %45 = vector.shape_cast %44 : vector<1x32x128xf32> to vector<32x128xf32>
    %cst_28 = arith.constant dense<0.000000e+00> : vector<32x128xf32>
    %46 = tpu.matmul %37, %45, %cst_28 {dimension_numbers = #tpu.dot_dimension_numbers<[1], [0], [0], [1], [0, 0, 1, 1], [], []>} : vector<32x32xf32>, vector<32x128xf32>, vector<32x128xf32> -> vector<32x128xf32>
    %c0_29 = arith.constant 0 : index
    %c0_30 = arith.constant 0 : index
    %47 = vector.load %arg3[%c0_29, %c0_30] : memref<16x48xf32, #tpu.memory_space<vmem>>, vector<16x48xf32>
    %c0_31 = arith.constant 0 : index
    %c0_32 = arith.constant 0 : index
    %48 = vector.load %arg9[%c0_31, %c0_32] : memref<1x128xf32, #tpu.memory_space<vmem>>, vector<1x128xf32>
    %49 = vector.extract_strided_slice %40 {offsets = [0, 0], sizes = [16, 128], strides = [1, 1]} : vector<32x128xf32> to vector<16x128xf32>
    %50 = vector.extract_strided_slice %43 {offsets = [0, 0], sizes = [16, 128], strides = [1, 1]} : vector<32x128xf32> to vector<16x128xf32>
    %51 = vector.extract_strided_slice %46 {offsets = [0, 0], sizes = [16, 128], strides = [1, 1]} : vector<32x128xf32> to vector<16x128xf32>
    %52 = tpu.concatenate %49, %50, %51 in 0 : vector<16x128xf32>, vector<16x128xf32>, vector<16x128xf32> -> vector<48x128xf32>
    %cst_33 = arith.constant dense<0.000000e+00> : vector<16x128xf32>
    %53 = tpu.matmul %47, %52, %cst_33 {dimension_numbers = #tpu.dot_dimension_numbers<[1], [0], [0], [1], [0, 0, 1, 1], [], []>} : vector<16x48xf32>, vector<48x128xf32>, vector<16x128xf32> -> vector<16x128xf32>
    %54 = vector.broadcast %48 : vector<1x128xf32> to vector<16x128xf32>
    %55 = arith.addf %53, %54 : vector<16x128xf32>
    %c0_34 = arith.constant 0 : index
    %c0_35 = arith.constant 0 : index
    %56 = vector.load %arg10[%c0_34, %c0_35] : memref<32x128xf32, #tpu.memory_space<vmem>>, vector<16x128xf32>
    tpu.vector_store %arg10[%c0_34, %c0_35], %55 {strides = array<i32>} : memref<32x128xf32, #tpu.memory_space<vmem>>, vector<16x128xf32>,
    %57 = vector.extract_strided_slice %40 {offsets = [16, 0], sizes = [16, 128], strides = [1, 1]} : vector<32x128xf32> to vector<16x128xf32>
    %58 = vector.extract_strided_slice %43 {offsets = [16, 0], sizes = [16, 128], strides = [1, 1]} : vector<32x128xf32> to vector<16x128xf32>
    %59 = vector.extract_strided_slice %46 {offsets = [16, 0], sizes = [16, 128], strides = [1, 1]} : vector<32x128xf32> to vector<16x128xf32>
    %60 = tpu.concatenate %57, %58, %59 in 0 : vector<16x128xf32>, vector<16x128xf32>, vector<16x128xf32> -> vector<48x128xf32>
    %cst_36 = arith.constant dense<0.000000e+00> : vector<16x128xf32>
    %61 = tpu.matmul %47, %60, %cst_36 {dimension_numbers = #tpu.dot_dimension_numbers<[1], [0], [0], [1], [0, 0, 1, 1], [], []>} : vector<16x48xf32>, vector<48x128xf32>, vector<16x128xf32> -> vector<16x128xf32>
    %62 = vector.broadcast %48 : vector<1x128xf32> to vector<16x128xf32>
    %63 = arith.addf %61, %62 : vector<16x128xf32>
    %c16 = arith.constant 16 : index
    %c0_37 = arith.constant 0 : index
    %64 = vector.load %arg10[%c16, %c0_37] : memref<32x128xf32, #tpu.memory_space<vmem>>, vector<16x128xf32>
    tpu.vector_store %arg10[%c16, %c0_37], %63 {strides = array<i32>} : memref<32x128xf32, #tpu.memory_space<vmem>>, vector<16x128xf32>,
    return
  }
  func.func @transform_0(%arg0: i32) -> (i32, i32) {
    %c0_i32 = arith.constant 0 : i32
    %c0_i32_0 = arith.constant 0 : i32
    %c0_i32_1 = arith.constant 0 : i32
    return %c0_i32, %c0_i32_0 : i32, i32
  }
  func.func @transform_1(%arg0: i32) -> (i32, i32) {
    %c0_i32 = arith.constant 0 : i32
    %c0_i32_0 = arith.constant 0 : i32
    %c0_i32_1 = arith.constant 0 : i32
    return %c0_i32, %c0_i32_0 : i32, i32
  }
  func.func @transform_2(%arg0: i32) -> (i32, i32) {
    %c0_i32 = arith.constant 0 : i32
    %c0_i32_0 = arith.constant 0 : i32
    %c0_i32_1 = arith.constant 0 : i32
    return %c0_i32, %c0_i32_0 : i32, i32
  }
  func.func @transform_3(%arg0: i32) -> (i32, i32) {
    %c0_i32 = arith.constant 0 : i32
    %c0_i32_0 = arith.constant 0 : i32
    %c0_i32_1 = arith.constant 0 : i32
    return %c0_i32, %c0_i32_0 : i32, i32
  }
  func.func @transform_4(%arg0: i32) -> (i32, i32) {
    %c0_i32 = arith.constant 0 : i32
    %c0_i32_0 = arith.constant 0 : i32
    %c0_i32_1 = arith.constant 0 : i32
    return %c0_i32, %c0_i32_0 : i32, i32
  }
  func.func @transform_5(%arg0: i32) -> (i32, i32) {
    %c0_i32 = arith.constant 0 : i32
    %c0_i32_0 = arith.constant 0 : i32
    %c0_i32_1 = arith.constant 0 : i32
    return %c0_i32, %c0_i32_0 : i32, i32
  }
  func.func @transform_6(%arg0: i32) -> (i32, i32) {
    %c0_i32 = arith.constant 0 : i32
    %c0_i32_0 = arith.constant 0 : i32
    %c0_i32_1 = arith.constant 0 : i32
    return %c0_i32, %c0_i32_0 : i32, i32
  }
  func.func @transform_7(%arg0: i32) -> (i32, i32, i32) {
    %c0_i32 = arith.constant 0 : i32
    %c0_i32_0 = arith.constant 0 : i32
    %c0_i32_1 = arith.constant 0 : i32
    %c0_i32_2 = arith.constant 0 : i32
    return %c0_i32, %c0_i32_0, %c0_i32_1 : i32, i32, i32
  }
  func.func @transform_8(%arg0: i32) -> (i32, i32) {
    %c0_i32 = arith.constant 0 : i32
    %c0_i32_0 = arith.constant 0 : i32
    %c0_i32_1 = arith.constant 0 : i32
    return %c0_i32, %c0_i32_0 : i32, i32
  }
  func.func @transform_9(%arg0: i32) -> (i32, i32) {
    %c0_i32 = arith.constant 0 : i32
    %c0_i32_0 = arith.constant 0 : i32
    %c0_i32_1 = arith.constant 0 : i32
    return %c0_i32, %c0_i32_0 : i32, i32
  }
}

</mosaic_0001>

<bundles_post_ra>
// kernel: tpu_custom_call.1
= control target key start
LH: loop header
LB: loop body
LE: loop exit
PB: predicated region body
PF: predicated region fallthrough
CT: control target
= control target key end

     0   :  { %14 = vsyncpa [#allocation3], 0  ;;  %s1602_s0 = inlined_call_operand.hbm [shape: f32[32,32], index: 0, kind: input, shape index: {}]   ;;  %s1603_s1 = inlined_call_operand.hbm [shape: f32[32,32], index: 1, kind: input, shape index: {}]   ;;  %s1604_s2 = inlined_call_operand.hbm [shape: f32[16,48], index: 2, kind: input, shape index: {}]   ;;  %s1605_s3 = inlined_call_operand.hbm [shape: f32[32,32], index: 3, kind: input, shape index: {}]   ;;  %s1606_s4 = inlined_call_operand.hbm [shape: f32[32,32], index: 4, kind: input, shape index: {}]   ;;  %s1607_s5 = inlined_call_operand.vmem [shape: f32[1,32], index: 5, kind: input, shape index: {}]   ;;  %s1608_s6 = inlined_call_operand.vmem [shape: f32[1,32], index: 6, kind: input, shape index: {}]   ;;  %s1609_s7 = inlined_call_operand.hbm [shape: f32[3,32,128], index: 7, kind: input, shape index: {}]   ;;  %s1610_s8 = inlined_call_operand.vmem [shape: f32[1,128], index: 8, kind: input, shape index: {}]   ;;  %s1611_s9 = inlined_call_operand.hbm [shape: f32[32,128], index: 9, kind: output, shape index: {}]  }
   0x1   :  { %15 = vsyncpa [#allocation6], 0 }
   0x2   :  { %16 = vsyncpa [#allocation9], 0 }
   0x3   :  { %17 = vsyncpa [#allocation12], 0 }
   0x4   :  { %18 = vsyncpa [#allocation4], 0  ;;  %s1340_s30 = smov [#allocation5]   ;;  %s1341_s11 = smov [#allocation8]  }
   0x5   :  { %s36_s10 = sshll.u32 %s1340_s30, 4  ;;  %s60_s12 = sshll.u32 %s1341_s11, 4  ;;  %s37_s10 = int_to_ptr.vmem [resolvable:$true] %s36_s10  ;;  %s1399_s12 = int_to_ptr.vmem [resolvable:$true] %s60_s12 }
   0x6   :  { %s1176_s15 = scalar_lea.hbm %s1603_s1, 512 }
   0x7   :  { %p1177_p0 = scmp.ne.s32.totalorder %s1603_s1, %s1176_s15  ;;  %p1180_p1 = scmp.lt.u32.totalorder %s1176_s15, %s1603_s1 }
   0x9   :  { %p1182_p2 = pnand %p1180_p1, %p1177_p0 }
   0xb   :  { %1185 = shalt.err (!%p1182_p2)
}
   0xc   :  { %s1186_s20 = scalar_lea.vmem %s37_s10, 512  ;;  %p1191_p4 = scmp.lt.s32.totalorder %s37_s10, %s37_s10 }
   0xd   :  { %p1187_p3 = scmp.ne.s32.totalorder %s37_s10, %s1186_s20  ;;  %p1192_p5 = scmp.lt.s32.totalorder %s1186_s20, %s1186_s20 }
   0xf   :  { %p1193_p6 = por %p1192_p5, %p1191_p4 }
  0x11   :  { %p1194_p7 = pnand %p1193_p6, %p1187_p3 }
  0x13   :  { %1197 = shalt.err (!%p1194_p7)
}
  0x14   :  { %s1342_s21 = smov 128   ;;  %s1343_s22 = smov 8  }
  0x15   :  { %42 = dma.hbm_to_vmem [thread:$0]  %s1603_s1, 512, %s37_s10, [#allocation6], %s1342_s21, %s1342_s21, %s1343_s22  }
  0x16   :  { %s1198_s27 = scalar_lea.hbm %s1605_s3, 512 }
  0x17   :  { %p1199_p8 = scmp.ne.s32.totalorder %s1605_s3, %s1198_s27  ;;  %p1202_p9 = scmp.lt.u32.totalorder %s1198_s27, %s1605_s3 }
  0x19   :  { %p1204_p10 = pnand %p1202_p9, %p1199_p8 }
  0x1b   :  { %1207 = shalt.err (!%p1204_p10)
}
  0x1c   :  { %s1208_s13 = scalar_lea.vmem %s1399_s12, 512  ;;  %p1213_p12 = scmp.lt.s32.totalorder %s1399_s12, %s1399_s12 }
  0x1d   :  { %p1209_p11 = scmp.ne.s32.totalorder %s1399_s12, %s1208_s13  ;;  %p1214_p13 = scmp.lt.s32.totalorder %s1208_s13, %s1208_s13 }
  0x1f   :  { %p1215_p0 = por %p1214_p13, %p1213_p12 }
  0x21   :  { %p1216_p1 = pnand %p1215_p0, %p1209_p11 }
  0x23   :  { %1219 = shalt.err (!%p1216_p1)
}
  0x24   :  { %66 = dma.hbm_to_vmem [thread:$0]  %s1605_s3, 512, %s1399_s12, [#allocation9], %s1342_s21, %s1342_s21, %s1343_s22  }
  0x25   :  { %s1344_s14 = smov [#allocation2]   ;;  %s1345_s16 = smov [#allocation7]  }
  0x26   :  { %s24_s15 = sshll.u32 %s1344_s14, 4  ;;  %s48_s17 = sshll.u32 %s1345_s16, 4  ;;  %s25_s15 = int_to_ptr.vmem [resolvable:$true] %s24_s15  ;;  %s1436_s17 = int_to_ptr.vmem [resolvable:$true] %s48_s17 }
  0x27   :  { %s1220_s20 = scalar_lea.hbm %s1602_s0, 512 }
  0x28   :  { %p1221_p2 = scmp.ne.s32.totalorder %s1602_s0, %s1220_s20  ;;  %p1224_p3 = scmp.lt.u32.totalorder %s1220_s20, %s1602_s0 }
  0x2a   :  { %p1226_p4 = pnand %p1224_p3, %p1221_p2 }
  0x2c   :  { %1229 = shalt.err (!%p1226_p4)
}
  0x2d   :  { %s1230_s3 = scalar_lea.vmem %s25_s15, 512  ;;  %p1235_p6 = scmp.lt.s32.totalorder %s25_s15, %s25_s15 }
  0x2e   :  { %p1231_p5 = scmp.ne.s32.totalorder %s25_s15, %s1230_s3  ;;  %p1236_p7 = scmp.lt.s32.totalorder %s1230_s3, %s1230_s3 }
  0x30   :  { %p1237_p8 = por %p1236_p7, %p1235_p6 }
  0x32   :  { %p1238_p9 = pnand %p1237_p8, %p1231_p5 }
  0x34   :  { %1241 = shalt.err (!%p1238_p9)
}
  0x35   :  { %30 = dma.hbm_to_vmem [thread:$0]  %s1602_s0, 512, %s25_s15, [#allocation3], %s1342_s21, %s1342_s21, %s1343_s22  }
  0x36   :  { %s1242_s30 = scalar_lea.hbm %s1604_s2, 256 }
  0x37   :  { %p1243_p10 = scmp.ne.s32.totalorder %s1604_s2, %s1242_s30  ;;  %p1246_p11 = scmp.lt.u32.totalorder %s1242_s30, %s1604_s2 }
  0x39   :  { %p1248_p12 = pnand %p1246_p11, %p1243_p10 }
  0x3b   :  { %1251 = shalt.err (!%p1248_p12)
}
  0x3c   :  { %s1252_s14 = scalar_lea.vmem %s1436_s17, 256  ;;  %p1257_p0 = scmp.lt.s32.totalorder %s1436_s17, %s1436_s17 }
  0x3d   :  { %p1253_p13 = scmp.ne.s32.totalorder %s1436_s17, %s1252_s14  ;;  %p1258_p1 = scmp.lt.s32.totalorder %s1252_s14, %s1252_s14 }
  0x3f   :  { %p1259_p2 = por %p1258_p1, %p1257_p0 }
  0x41   :  { %p1260_p3 = pnand %p1259_p2, %p1253_p13 }
  0x43   :  { %1263 = shalt.err (!%p1260_p3)
}
  0x44   :  { %54 = dma.hbm_to_vmem [thread:$0]  %s1604_s2, 256, %s1436_s17, [#allocation6], %s1342_s21, %s1342_s21, %s1343_s22  }
  0x45   :  { %s1346_s16 = smov [#allocation10]   ;;  %s1347_s19 = smov [#allocation11]  }
  0x46   :  { %s72_s18 = sshll.u32 %s1346_s16, 4  ;;  %s88_s20 = sshll.u32 %s1347_s19, 4  ;;  %s73_s18 = int_to_ptr.vmem [resolvable:$true] %s72_s18  ;;  %s1473_s20 = int_to_ptr.vmem [resolvable:$true] %s88_s20 }
  0x47   :  { %s1264_s25 = scalar_lea.hbm %s1606_s4, 512 }
  0x48   :  { %p1265_p4 = scmp.ne.s32.totalorder %s1606_s4, %s1264_s25  ;;  %p1268_p5 = scmp.lt.u32.totalorder %s1264_s25, %s1606_s4 }
  0x4a   :  { %p1270_p6 = pnand %p1268_p5, %p1265_p4 }
  0x4c   :  { %1273 = shalt.err (!%p1270_p6)
}
  0x4d   :  { %s1274_s2 = scalar_lea.vmem %s73_s18, 512  ;;  %p1279_p8 = scmp.lt.s32.totalorder %s73_s18, %s73_s18 }
  0x4e   :  { %p1275_p7 = scmp.ne.s32.totalorder %s73_s18, %s1274_s2  ;;  %p1280_p9 = scmp.lt.s32.totalorder %s1274_s2, %s1274_s2 }
  0x50   :  { %p1281_p10 = por %p1280_p9, %p1279_p8 }
  0x52   :  { %p1282_p11 = pnand %p1281_p10, %p1275_p7 }
  0x54   :  { %1285 = shalt.err (!%p1282_p11)
}
  0x55   :  { %78 = dma.hbm_to_vmem [thread:$0]  %s1606_s4, 512, %s73_s18, [#allocation9], %s1342_s21, %s1342_s21, %s1343_s22  }
  0x56   :  { %s1286_s11 = scalar_lea.hbm %s1609_s7, 1536 }
  0x57   :  { %p1287_p12 = scmp.ne.s32.totalorder %s1609_s7, %s1286_s11  ;;  %p1290_p13 = scmp.lt.u32.totalorder %s1286_s11, %s1609_s7 }
  0x59   :  { %p1292_p0 = pnand %p1290_p13, %p1287_p12 }
  0x5b   :  { %1295 = shalt.err (!%p1292_p0)
}
  0x5c   :  { %s1296_s0 = scalar_lea.vmem %s1473_s20, 1536  ;;  %p1301_p2 = scmp.lt.s32.totalorder %s1473_s20, %s1473_s20 }
  0x5d   :  { %p1297_p1 = scmp.ne.s32.totalorder %s1473_s20, %s1296_s0  ;;  %p1302_p3 = scmp.lt.s32.totalorder %s1296_s0, %s1296_s0 }
  0x5f   :  { %p1303_p4 = por %p1302_p3, %p1301_p2 }
  0x61   :  { %p1304_p5 = pnand %p1303_p4, %p1297_p1 }
  0x63   :  { %1307 = shalt.err (!%p1304_p5)
}
  0x64   :  { %94 = dma.hbm_to_vmem [thread:$0]  %s1609_s7, 1536, %s1473_s20, [#allocation12], %s1342_s21, %s1342_s21, %s1343_s22  }
  0x65   :  { %1330 = dma.done.wait [#allocation3], 512  }
  0x66   :  { %1331 = vsyncadd [#allocation3], 4294966784 }
  0x67   :  { %1332 = dma.done.wait [#allocation6], 768  }
  0x68   :  { %1333 = vsyncadd [#allocation6], 4294966528 }
  0x69   :  { %1334 = dma.done.wait [#allocation9], 1024  }
  0x6a   :  { %1335 = vsyncadd [#allocation9], 4294966272 }
  0x6b   :  { %1336 = dma.done.wait [#allocation12], 1536  }
  0x6c   :  { %1337 = vsyncadd [#allocation12], 4294965760  ;;  %vm162_vm0 = vcmask 261120   ;;  %v1510_v0 = vld [vmem:[#allocation2] sm:$0xff]  ;;  %v1512_v1 = vld [vmem:[#allocation2 + $0x10] sm:$0xff]  ;;  %vm711_vm1 = vcmask 392192  }
  0x6d   :  { %v1514_v2 = vld [vmem:[#allocation2 + $0x8] sm:$0xff]  ;;  %v356_v3 = vsel %vm162_vm0, %v1510_v0, 0.0  ;;  %v362_v4 = vsel %vm162_vm0, %v1512_v1, 0.0  ;;  %v1520_v5 = vld [vmem:[#allocation2 + $0x18] sm:$0xff]  ;;  %v260_v6 = vld [vmem:[#allocation10] sm:$0xff]  ;;  %s1348_s20 = smov [#allocation13]  }
  0x6e   :  { %v261_v7 = vld [vmem:[#allocation10 + $0x8] sm:$0xff]  ;;  %357 = vadd.xlane.f32.xlu0 %v356_v3  ;;  %363 = vadd.xlane.f32.xlu1 %v362_v4  ;;  %v151_v9 = vld [vmem:[#allocation8] sm:$0xff]  ;;  %v262_v11 = vld [vmem:[#allocation10 + $0x10] sm:$0xff]  ;;  %v359_v12 = vsel %vm162_vm0, %v1514_v2, 0.0  ;;  %v365_v13 = vsel %vm162_vm0, %v1520_v5, 0.0  ;;  %s877_s23 = sshll.u32 %s1348_s20, 4  ;;  %s878_s23 = int_to_ptr.vmem [resolvable:$true] %s877_s23 }
  0x6f   :  { %v1087_v8 = vpack.c.bf16 %v261_v7, %v260_v6  ;;  %v152_v10 = vld [vmem:[#allocation8 + $0x8] sm:$0xff]  ;;  %v263_v15 = vld [vmem:[#allocation10 + $0x18] sm:$0xff]  ;;  %v119_v16 = vld [vmem:[#allocation5] sm:$0xff]  ;;  %s1308_s24 = scalar_lea.vmem %s878_s23, 512  ;;  %p1313_p7 = scmp.lt.s32.totalorder %s878_s23, %s878_s23 }
  0x70   :  { %v1079_v14 = vpack.c.bf16 %v152_v10, %v151_v9  ;;  %v153_v17 = vld [vmem:[#allocation8 + $0x10] sm:$0xff]  ;;  %v1091_v18 = vpack.c.bf16 %v263_v15, %v262_v11  ;;  %v892_v19 = vmul.f32 -1.442695, %v119_v16  ;;  %v154_v20 = vld [vmem:[#allocation8 + $0x18] sm:$0xff]  ;;  %v121_v22 = vld [vmem:[#allocation5 + $0x10] sm:$0xff]  ;;  %p1309_p6 = scmp.ne.s32.totalorder %s878_s23, %s1308_s24  ;;  %p1314_p8 = scmp.lt.s32.totalorder %s1308_s24, %s1308_s24 }
  0x71   :  { %1088 = vmatprep.subr.bf16.mxu1 %v1087_v8  ;;  %v120_v21 = vld [vmem:[#allocation5 + $0x8] sm:$0xff]  ;;  %v1083_v23 = vpack.c.bf16 %v154_v20, %v153_v17  ;;  %v894_v25 = vmul.f32 -1.442695, %v121_v22  ;;  %v122_v26 = vld [vmem:[#allocation5 + $0x18] sm:$0xff]  ;;  %v423_v6 = vld [vmem:[#allocation11 + $0x10] sm:$0xff] }
  0x72   :  { %1090 = vmatpush3.bf16.msra.mxu1 %v1087_v8  ;;  %1080 = vmatprep.subr.bf16.mxu0 %v1079_v14  ;;  %v893_v24 = vmul.f32 -1.442695, %v120_v21  ;;  %1152 = vpow2.f32 %v892_v19  ;;  %v895_v27 = vmul.f32 -1.442695, %v122_v26  ;;  %v524_v4 = vld [vmem:[#allocation11 + $0x28] sm:$0xff]  ;;  %v424_v7 = vld [vmem:[#allocation11 + $0x18] sm:$0xff]  ;;  %p1315_p9 = por %p1314_p8, %p1313_p7 }
  0x73   :  { %360 = vadd.xlane.f32.xlu0 %v359_v12  ;;  %366 = vadd.xlane.f32.xlu1 %v365_v13  ;;  %v525_v8 = vld [vmem:[#allocation11 + $0x30] sm:$0xff]  ;;  %v1099_v9 = vpack.c.bf16 %v424_v7, %v423_v6  ;;  %v526_v10 = vld [vmem:[#allocation11 + $0x38] sm:$0xff]  ;;  %v613_v12 = vld [vmem:[#allocation11 + $0x40] sm:$0xff] }
  0x74   :  { %1092 = vmatprep.subr.bf16.mxu1 %v1091_v18  ;;  %1082 = vmatpush3.bf16.msra.mxu0 %v1079_v14  ;;  %1154 = vpow2.f32 %v893_v24  ;;  %v1107_v11 = vpack.c.bf16 %v526_v10, %v525_v8  ;;  %v614_v13 = vld [vmem:[#allocation11 + $0x48] sm:$0xff]  ;;  %p1316_p10 = pnand %p1315_p9, %p1309_p6 }
  0x75   :  { %1084 = vmatprep.subr.bf16.mxu0 %v1083_v23  ;;  %1156 = vpow2.f32 %v894_v25  ;;  %v1111_v14 = vpack.c.bf16 %v614_v13, %v613_v12 }
  0x76   :  { %1094 = vmatpush3.bf16.msra.mxu1 %v1091_v18  ;;  %1158 = vpow2.f32 %v895_v27 }
  0x78   :  { %1086 = vmatpush3.bf16.msra.mxu0 %v1083_v23 }
  0x7c   :  { %v1153_v28 = vpop.eup %1152 }
  0x7d   :  { %v135_v30 = vadd.f32 1.0, %v1153_v28 }
  0x7e   :  { %v1155_v29 = vpop.eup %1154 }
  0x7f   :  { %v1157_v31 = vpop.eup %1156  ;;  %v136_v32 = vadd.f32 1.0, %v1155_v29  ;;  %1160 = vrcp.f32 %v135_v30 }
  0x80   :  { %v1159_v33 = vpop.eup %1158  ;;  %v137_v34 = vadd.f32 1.0, %v1157_v31 }
  0x81   :  { %1162 = vrcp.f32 %v136_v32  ;;  %v138_v35 = vadd.f32 1.0, %v1159_v33  ;;  %v901_v32 = vld [vmem:[%s1608_s6] ss:$0 sm:$0xff] }
  0x82   :  { %1164 = vrcp.f32 %v137_v34 }
  0x83   :  { %1166 = vrcp.f32 %v138_v35 }
  0x89   :  { %v1161_v36 = vpop.eup %1160 }
  0x8a   :  { %v147_v38 = vmul.f32 %v1161_v36, %v119_v16 }
  0x8b   :  { %v1163_v37 = vpop.eup %1162 }
  0x8c   :  { %v1165_v39 = vpop.eup %1164  ;;  %v148_v40 = vmul.f32 %v1163_v37, %v120_v21  ;;  %1001 = vmatprep.mubr.msk.f32.mxu1 %vm162_vm0, %v147_v38  ;;  %987 = vmatprep.mubr.msk.f32.mxu0 %vm162_vm0, %v147_v38  ;;  %v896_v37 = vld [vmem:[%s1607_s5] ss:$0 sm:$0xff] }
  0x8d   :  { %v1167_v41 = vpop.eup %1166  ;;  %v149_v42 = vmul.f32 %v1165_v39, %v121_v22 }
  0x8e   :  { %1002 = vmatmul.mubr.msk.f32.vlgmr.msra.gmra.mrb[0].mxu1 %vm162_vm0, %v148_v40  ;;  %988 = vmatmul.mubr.msk.f32.vlgmr.msra.gmra.mrb[0].mxu0 %vm162_vm0, %v148_v40  ;;  %v150_v43 = vmul.f32 %v1167_v41, %v122_v26 }
  0x8f   :  { %1004 = vmatprep.mubr.msk.f32.mxu1 %vm162_vm0, %v149_v42  ;;  %990 = vmatprep.mubr.msk.f32.mxu0 %vm162_vm0, %v149_v42 }
  0x92   :  { %1005 = vmatmul.mubr.msk.f32.gmra.mrb[2].mxu1 %vm162_vm0, %v150_v43  ;;  %991 = vmatmul.mubr.msk.f32.gmra.mrb[2].mxu0 %vm162_vm0, %v150_v43 }
  0xfb   :  { %v358_v44 = vpop.xlane.xlu0 %357  ;;  %v364_v45 = vpop.xlane.xlu1 %363 }
  0xfc   :  { %v369_v46 = vmul.f32 0.03125, %v358_v44  ;;  %v371_v47 = vmul.f32 0.03125, %v364_v45 }
  0xfe   :  { %v1535_v48 = vsub.f32 %v1510_v0, %v369_v46  ;;  %v1538_v49 = vsub.f32 %v1512_v1, %v371_v47  ;;  %v421_v0 = vld [vmem:[#allocation11] sm:$0xff]  ;;  %v422_v1 = vld [vmem:[#allocation11 + $0x8] sm:$0xff] }
  0xff   :  { %v1095_v3 = vpack.c.bf16 %v422_v1, %v421_v0 }
 0x100   :  { %v361_v50 = vpop.xlane.xlu0 %360  ;;  %v367_v51 = vpop.xlane.xlu1 %366  ;;  %v377_v54 = vmul.f32 %v1535_v48, %v1535_v48  ;;  %v379_v55 = vmul.f32 %v1538_v49, %v1538_v49 }
 0x101   :  { %v370_v52 = vmul.f32 0.03125, %v361_v50  ;;  %v372_v53 = vmul.f32 0.03125, %v367_v51  ;;  %1096 = vmatprep.subr.bf16.mxu0 %v1095_v3 }
 0x102   :  { %v381_v58 = vsel %vm162_vm0, %v377_v54, 0.0  ;;  %v387_v59 = vsel %vm162_vm0, %v379_v55, 0.0  ;;  %1098 = vmatpush3.bf16.msra.mxu0 %v1095_v3 }
 0x103   :  { %v1545_v56 = vsub.f32 %v1514_v2, %v370_v52  ;;  %v1548_v57 = vsub.f32 %v1520_v5, %v372_v53  ;;  %382 = vadd.xlane.f32.xlu0 %v381_v58  ;;  %v523_v2 = vld [vmem:[#allocation11 + $0x20] sm:$0xff]  ;;  %1100 = vmatprep.subr.bf16.mxu0 %v1099_v9  ;;  %v615_v58 = vld [vmem:[#allocation11 + $0x50] sm:$0xff] }
 0x104   :  { %v1103_v5 = vpack.c.bf16 %v524_v4, %v523_v2 }
 0x105   :  { %v378_v60 = vmul.f32 %v1545_v56, %v1545_v56  ;;  %v380_v61 = vmul.f32 %v1548_v57, %v1548_v57 }
 0x106   :  { %1104 = vmatprep.subr.bf16.mxu1 %v1103_v5  ;;  %1102 = vmatpush3.bf16.msra.mxu0 %v1099_v9 }
 0x107   :  { %v384_v62 = vsel %vm162_vm0, %v378_v60, 0.0  ;;  %388 = vadd.xlane.f32.xlu0 %v387_v59  ;;  %v390_v63 = vsel %vm162_vm0, %v380_v61, 0.0  ;;  %1106 = vmatpush3.bf16.msra.mxu1 %v1103_v5  ;;  %v616_v59 = vld [vmem:[#allocation11 + $0x58] sm:$0xff] }
 0x108   :  { %385 = vadd.xlane.f32.xlu1 %v384_v62  ;;  %1108 = vmatprep.subr.bf16.mxu1 %v1107_v11  ;;  %v1115_v1 = vpack.c.bf16 %v616_v59, %v615_v58 }
 0x109   :  { %1112 = vmatprep.subr.bf16.mxu0 %v1111_v14 }
 0x10b   :  { %1110 = vmatpush3.bf16.msra.mxu1 %v1107_v11 }
 0x10c   :  { %391 = vadd.xlane.f32.xlu1 %v390_v63 }
 0x161   :  { %v1003_v15 = vpop.f32.mrb[0].mxu1  ;;  %v989_v16 = vpop.f32.mrb[0].mxu0 }
 0x162   :  { %v337_v17 = vpop.f32.mrb[1].mxu1  ;;  %v241_v18 = vpop.f32.mrb[1].mxu0  ;;  %v343_v41 = vadd.f32 %v1003_v15, %v901_v32  ;;  %v247_v61 = vadd.f32 %v989_v16, %v896_v37 }
 0x163   :  { %v338_v35 = vadd.f32 %v901_v32, %v337_v17  ;;  %v242_v43 = vadd.f32 %v896_v37, %v241_v18 }
 0x164   :  { %v410_v51 = vadd.f32 1.0, %v343_v41 }
 0x165   :  { %v1006_v19 = vpop.f32.mrb[2].mxu1  ;;  %v992_v20 = vpop.f32.mrb[2].mxu0  ;;  %v409_v38 = vadd.f32 1.0, %v338_v35 }
 0x166   :  { %v347_v21 = vpop.f32.mrb[3].mxu1  ;;  %v251_v22 = vpop.f32.mrb[3].mxu0  ;;  %v353_v52 = vadd.f32 %v1006_v19, %v901_v32  ;;  %v257_v4 = vadd.f32 %v992_v20, %v896_v37 }
 0x167   :  { %v348_v40 = vadd.f32 %v901_v32, %v347_v21  ;;  %v252_v55 = vadd.f32 %v896_v37, %v251_v22  ;;  %v703_v22 = vld [vmem:[#allocation7 + $0x8] sm:$0xff] }
 0x169   :  { %v411_v46 = vadd.f32 1.0, %v348_v40 }
 0x190   :  { %v383_v23 = vpop.xlane.xlu0 %382 }
 0x191   :  { %v393_v24 = vmul.f32 0.03125, %v383_v23 }
 0x193   :  { %v397_v25 = vadd.f32 1e-06, %v393_v24  ;;  %v918_v24 = vld [vmem:[%s1610_s8] ss:$0 sm:$0xff] }
 0x194   :  { %v389_v27 = vpop.xlane.xlu0 %388 }
 0x195   :  { %v386_v26 = vpop.xlane.xlu1 %385  ;;  %1168 = vrsqrt.f32 %v397_v25  ;;  %v395_v29 = vmul.f32 0.03125, %v389_v27 }
 0x196   :  { %v394_v28 = vmul.f32 0.03125, %v386_v26 }
 0x197   :  { %v399_v31 = vadd.f32 1e-06, %v395_v29 }
 0x198   :  { %v398_v30 = vadd.f32 1e-06, %v394_v28 }
 0x199   :  { %v392_v33 = vpop.xlane.xlu1 %391 }
 0x19a   :  { %1170 = vrsqrt.f32 %v398_v30  ;;  %v396_v34 = vmul.f32 0.03125, %v392_v33 }
 0x19b   :  { %1172 = vrsqrt.f32 %v399_v31 }
 0x19c   :  { %v400_v36 = vadd.f32 1e-06, %v396_v34 }
 0x19e   :  { %1174 = vrsqrt.f32 %v400_v36 }
 0x19f   :  { %v1169_v39 = vpop.eup %1168 }
 0x1a0   :  { %v405_v42 = vmul.f32 %v1169_v39, %v1535_v48 }
 0x1a2   :  { %v413_v44 = vmul.f32 %v409_v38, %v405_v42 }
 0x1a4   :  { %v1171_v45 = vpop.eup %1170  ;;  %v417_v53 = vadd.f32 %v413_v44, %v242_v43 }
 0x1a5   :  { %v1173_v47 = vpop.eup %1172  ;;  %v406_v50 = vmul.f32 %v1171_v45, %v1545_v56  ;;  %v412_v56 = vadd.f32 1.0, %v353_v52 }
 0x1a6   :  { %v407_v54 = vmul.f32 %v1173_v47, %v1538_v49  ;;  %1015 = vmatprep.mubr.msk.f32.mxu0 %vm162_vm0, %v417_v53  ;;  %1029 = vmatprep.mubr.msk.f32.mxu1 %vm162_vm0, %v417_v53 }
 0x1a7   :  { %v414_v60 = vmul.f32 %v410_v51, %v406_v50 }
 0x1a8   :  { %v1175_v48 = vpop.eup %1174  ;;  %v415_v62 = vmul.f32 %v411_v46, %v407_v54 }
 0x1a9   :  { %v418_v63 = vadd.f32 %v414_v60, %v247_v61  ;;  %v408_v0 = vmul.f32 %v1175_v48, %v1548_v57  ;;  %v702_v57 = vld [vmem:[#allocation7] sm:$0xff] }
 0x1aa   :  { %v419_v2 = vadd.f32 %v415_v62, %v252_v55 }
 0x1ab   :  { %v416_v3 = vmul.f32 %v412_v56, %v408_v0  ;;  %1016 = vmatmul.mubr.msk.f32.vlgmr.msra.gmra.mrb[4].mxu0 %vm162_vm0, %v418_v63  ;;  %1030 = vmatmul.mubr.msk.f32.vlgmr.msra.gmra.mrb[4].mxu1 %vm162_vm0, %v418_v63 }
 0x1ac   :  { %1114 = vmatpush3.bf16.msra.mxu0 %v1111_v14  ;;  %1018 = vmatprep.mubr.msk.f32.mxu0 %vm162_vm0, %v419_v2 }
 0x1ad   :  { %v420_v49 = vadd.f32 %v416_v3, %v257_v4  ;;  %1032 = vmatprep.mubr.msk.f32.mxu1 %vm162_vm0, %v419_v2  ;;  %1116 = vmatprep.subr.bf16.mxu0 %v1115_v1 }
 0x1af   :  { %1019 = vmatmul.mubr.msk.f32.gmra.mrb[6].mxu0 %vm162_vm0, %v420_v49  ;;  %1033 = vmatmul.mubr.msk.f32.gmra.mrb[6].mxu1 %vm162_vm0, %v420_v49 }
 0x1b0   :  { %1118 = vmatpush3.bf16.msra.mxu0 %v1115_v1  ;;  %1043 = vmatprep.mubr.msk.f32.mxu0 %vm162_vm0, %v417_v53 }
 0x1b1   :  { %1061 = vmatprep.mubr.msk.f32.mxu1 %vm711_vm1, %v702_v57 }
 0x1b3   :  { %1044 = vmatmul.mubr.msk.f32.vlgmr.msra.gmra.mrb[8].mxu0 %vm162_vm0, %v418_v63 }
 0x1b4   :  { %1046 = vmatprep.mubr.msk.f32.mxu0 %vm162_vm0, %v419_v2 }
 0x1b7   :  { %1047 = vmatmul.mubr.msk.f32.gmra.mrb[10].mxu0 %vm162_vm0, %v420_v49 }
 0x1b8   :  { %1076 = vmatprep.mubr.msk.f32.mxu0 %vm711_vm1, %v702_v57 }
 0x27e   :  { %v1017_v5 = vpop.f32.mrb[4].mxu0  ;;  %v1031_v6 = vpop.f32.mrb[4].mxu1 }
 0x27f   :  { %v503_v7 = vpop.f32.mrb[5].mxu0  ;;  %v593_v8 = vpop.f32.mrb[5].mxu1 }
 0x280   :  { %v1119_v9 = vpack.c.bf16 %v1017_v5, %v503_v7  ;;  %v1123_v10 = vpack.c.bf16 %v1031_v6, %v593_v8 }
 0x282   :  { %v1020_v11 = vpop.f32.mrb[6].mxu0  ;;  %v1034_v12 = vpop.f32.mrb[6].mxu1  ;;  %1120 = vmatprep.subr.bf16.mxu1 %v1119_v9 }
 0x283   :  { %v513_v13 = vpop.f32.mrb[7].mxu0  ;;  %v603_v14 = vpop.f32.mrb[7].mxu1  ;;  %1122 = vmatpush3.bf16.msra.mxu1 %v1119_v9 }
 0x284   :  { %v1131_v15 = vpack.c.bf16 %v1020_v11, %v513_v13  ;;  %v1135_v16 = vpack.c.bf16 %v1034_v12, %v603_v14  ;;  %1124 = vmatprep.subr.bf16.mxu1 %v1123_v10 }
 0x286   :  { %v1045_v17 = vpop.f32.mrb[8].mxu0  ;;  %1132 = vmatprep.subr.bf16.mxu0 %v1131_v15 }
 0x287   :  { %v683_v18 = vpop.f32.mrb[9].mxu0  ;;  %1126 = vmatpush3.bf16.msra.mxu1 %v1123_v10  ;;  %1134 = vmatpush3.bf16.msra.mxu0 %v1131_v15 }
 0x288   :  { %v1127_v19 = vpack.c.bf16 %v1045_v17, %v683_v18  ;;  %1136 = vmatprep.subr.bf16.mxu0 %v1135_v16 }
 0x28a   :  { %v1048_v20 = vpop.f32.mrb[10].mxu0  ;;  %1128 = vmatprep.subr.bf16.mxu1 %v1127_v19 }
 0x28b   :  { %v693_v21 = vpop.f32.mrb[11].mxu0  ;;  %1130 = vmatpush3.bf16.msra.mxu1 %v1127_v19  ;;  %1138 = vmatpush3.bf16.msra.mxu0 %v1135_v16 }
 0x28c   :  { %v1139_v23 = vpack.c.bf16 %v1048_v20, %v693_v21 }
 0x28e   :  { %1140 = vmatprep.subr.bf16.mxu0 %v1139_v23  ;;  %1062 = vmatmul.mubr.msk.f32.vlgmr.msra.gmra.mrb[8].mxu1 %vm711_vm1, %v703_v22 }
 0x28f   :  { %1142 = vmatpush3.bf16.msra.mxu0 %v1139_v23 }
 0x292   :  { %1077 = vmatmul.mubr.msk.f32.vlgmr.msra.gmra.mrb[12].mxu0 %vm711_vm1, %v703_v22 }
 0x361   :  { %v1063_v25 = vpop.f32.mrb[8].mxu1 }
 0x362   :  { %v790_v26 = vadd.f32 %v1063_v25, %v918_v24  ;;  %v784_v27 = vpop.f32.mrb[9].mxu1 }
 0x363   :  { %v785_v28 = vadd.f32 %v918_v24, %v784_v27 }
 0x364   :  { %794 = vst [vmem:[#allocation13 + $0x8] sm:$0xff] %v790_v26 }
 0x365   :  { %793 = vst [vmem:[#allocation13] sm:$0xff] %v785_v28  ;;  %v1078_v29 = vpop.f32.mrb[12].mxu0 }
 0x366   :  { %v867_v30 = vadd.f32 %v1078_v29, %v918_v24  ;;  %v861_v31 = vpop.f32.mrb[13].mxu0 }
 0x367   :  { %v862_v32 = vadd.f32 %v918_v24, %v861_v31 }
 0x368   :  { %871 = vst [vmem:[#allocation13 + $0x18] sm:$0xff] %v867_v30 }
 0x369   :  { %870 = vst [vmem:[#allocation13 + $0x10] sm:$0xff] %v862_v32 }
 0x36a   :  { %1319 = shalt.err (!%p1316_p10)
}
 0x36b   :  { %s1320_s26 = scalar_lea.hbm %s1611_s9, 512 }
 0x36c   :  { %p1321_p11 = scmp.ne.s32.totalorder %s1611_s9, %s1320_s26  ;;  %p1324_p12 = scmp.lt.u32.totalorder %s1320_s26, %s1611_s9 }
 0x36e   :  { %p1326_p13 = pnand %p1324_p12, %p1321_p11 }
 0x370   :  { %1329 = shalt.err (!%p1326_p13)
}
 0x371   :  { %883 = dma.vmem_to_hbm [thread:$0]  %s878_s23, 512, %s1611_s9, [#allocation4], %s1342_s21, %s1342_s21, %s1343_s22  }
 0x372   :  { %1338 = dma.done.wait [#allocation4], 512  }
 0x373   :  { %1339 = vsyncadd [#allocation4], 4294966784 }
 0x374   :  { %887 = vsyncpa [#allocation3], 1 }
 0x375   :  { %888 = vsyncpa [#allocation6], 1 }
 0x376   :  { %889 = vsyncpa [#allocation9], 1 }
 0x377   :  { %890 = vsyncpa [#allocation12], 1 }
 0x378   :  { %891 = vsyncpa [#allocation4], 1 }

</bundles_post_ra>
